<compile_context>
chip_gen: v7x
topology: tpu7x:2x2x1
jax: 0.10.0
libtpu: 0.0.40
codegen_flags: <defaults>
</compile_context>

<pallas_src>
import jax
import jax.numpy as jnp
from jax.experimental import pallas as pl
from jax.experimental.pallas import tpu as pltpu


IN_FEATURES = 4
HIDDEN = 4
OUT_FEATURES = 3


def _round_up(x, m):
    return ((x + m - 1) // m) * m


def mlp_kernel(w1_ref, b1_ref, w2_ref, b2_ref, x_ref, o_ref):
    """One batch tile, batch on lanes.

    x_ref : (4, TB) f32 VMEM   features on sublanes, batch on lanes
    w1_ref: (4, 4)  f32 SMEM   [in, out]
    b1_ref: (4,)    f32 SMEM
    w2_ref: (4, 3)  f32 SMEM   [in, out]
    b2_ref: (3,)    f32 SMEM
    o_ref : (3, TB) f32 VMEM   lane-dense output store
    """
    x = x_ref[...]                                   # (4, TB)

    # ---- Layer 1 + ReLU: h[j,:] = relu(sum_k w1[k,j] * x[k,:] + b1[j]) ----
    # Fully unrolled VPU scalar*vector FMAs; no MXU for a 4-wide contraction.
    h_rows = []
    for j in range(HIDDEN):
        acc = x[0:1, :] * w1_ref[0, j]
        for k in range(1, IN_FEATURES):
            acc = acc + x[k:k + 1, :] * w1_ref[k, j]
        acc = acc + b1_ref[j]
        h_rows.append(jnp.maximum(acc, 0.0))         # (1, TB)

    # ---- Layer 2: y[j,:] = sum_k w2[k,j] * h[k,:] + b2[j] ----
    y_rows = []
    for j in range(OUT_FEATURES):
        acc = h_rows[0] * w2_ref[0, j]
        for k in range(1, HIDDEN):
            acc = acc + h_rows[k] * w2_ref[k, j]
        y_rows.append(acc + b2_ref[j])               # (1, TB)

    # Single lane-dense store of the whole (3, TB) tile.
    o_ref[...] = jnp.concatenate(y_rows, axis=0).astype(o_ref.dtype)


def mynet_forward(x, w1, b1, w2, b2, *, tb=512):
    """x: (B, 4) f32. Returns (B, 3) f32.

    w1: (4, 4) [in, out], b1: (4,), w2: (4, 3) [in, out], b2: (3,).
    """
    B = x.shape[0]

    # Put batch on the lane axis and pad it to a multiple of the lane tile.
    xt = jnp.asarray(x, jnp.float32).T               # (4, B)
    tb = min(tb, _round_up(B, 128))                  # lane tile, multiple of 128
    Bp = _round_up(B, tb)
    if Bp != B:
        xt = jnp.pad(xt, ((0, 0), (0, Bp - B)))
    grid = (Bp // tb,)

    smem_spec = pl.BlockSpec(memory_space=pltpu.MemorySpace.SMEM)

    cost = pl.CostEstimate(
        flops=2 * Bp * (IN_FEATURES * HIDDEN + HIDDEN * OUT_FEATURES),
        transcendentals=0,
        bytes_accessed=4 * (Bp * (IN_FEATURES + OUT_FEATURES)
                            + w1.size + b1.size + w2.size + b2.size),
    )

    yt = pl.pallas_call(
        mlp_kernel,
        out_shape=jax.ShapeDtypeStruct((OUT_FEATURES, Bp), jnp.float32),
        grid=grid,
        in_specs=[
            smem_spec,                                   # w1 (resident in SMEM)
            smem_spec,                                   # b1
            smem_spec,                                   # w2
            smem_spec,                                   # b2
            pl.BlockSpec((IN_FEATURES, tb), lambda i: (0, i)),   # x tile
        ],
        out_specs=pl.BlockSpec((OUT_FEATURES, tb), lambda i: (0, i)),
        compiler_params=pltpu.CompilerParams(
            dimension_semantics=("parallel",),           # shard over 2 TCs on v7x
            vmem_limit_bytes=32 * 1024 * 1024,           # safe on v5e/v6e/v7x
        ),
        cost_estimate=cost,
    )(w1, b1, w2, b2, xt)

    return yt[:, :B].T                                   # back to (B, 3)


def init_params(key):
    """Deterministic init mirroring nn.Linear's uniform(-1/sqrt(fan_in), +)."""
    k1, k2, k3, k4 = jax.random.split(key, 4)
    bound = 1.0 / jnp.sqrt(4.0)                          # fan_in = 4 for both
    # Stored as (in, out): x @ W here == x @ W_torch.T in PyTorch.
    w1 = jax.random.uniform(k1, (IN_FEATURES, HIDDEN), jnp.float32, -bound, bound)
    b1 = jax.random.uniform(k2, (HIDDEN,), jnp.float32, -bound, bound)
    w2 = jax.random.uniform(k3, (HIDDEN, OUT_FEATURES), jnp.float32, -bound, bound)
    b2 = jax.random.uniform(k4, (OUT_FEATURES,), jnp.float32, -bound, bound)
    return w1, b1, w2, b2


def reference_forward(x, w1, b1, w2, b2):
    h = jnp.maximum(x @ w1 + b1[None, :], 0.0)
    return h @ w2 + b2[None, :]


if __name__ == "__main__":
    key = jax.random.PRNGKey(0)
    kx, kp = jax.random.split(key)
    w1, b1, w2, b2 = init_params(kp)

    # Small batch (padding path, single tile) and a larger batch that
    # exercises the multi-tile grid + tail padding.
    for B in (8, 1000):
        x = jax.random.normal(jax.random.fold_in(kx, B), (B, IN_FEATURES),
                              jnp.float32)
        out = jax.block_until_ready(mynet_forward(x, w1, b1, w2, b2, tb=256))
        ref = reference_forward(x, w1, b1, w2, b2)
        assert out.shape == (B, OUT_FEATURES)
        assert jnp.allclose(out, ref, atol=1e-5, rtol=1e-5), \
            float(jnp.max(jnp.abs(out - ref)))

    print("KERNEL_OK")
</pallas_src>

<mosaic_0001>
module attributes {stable_mosaic.version = 11 : i64} {
  func.func @mlp_kernel(%arg0: i32, %arg1: memref<4x4xf32, #tpu.memory_space<smem>>, %arg2: memref<4xf32, #tpu.memory_space<smem>>, %arg3: memref<4x3xf32, #tpu.memory_space<smem>>, %arg4: memref<3xf32, #tpu.memory_space<smem>>, %arg5: memref<4x128xf32, #tpu.memory_space<vmem>>, %arg6: memref<3x128xf32, #tpu.memory_space<vmem>>) attributes {dimension_semantics = [#tpu.dimension_semantics<parallel>], iteration_bounds = array<i64: 1>, scalar_prefetch = 0 : i64, scratch_operands = 0 : i64, tpu.core_type = #tpu.core_type<tc>, window_params = [{transform_indices = @transform_0, window_bounds = array<i64: 4, 4>}, {transform_indices = @transform_1, window_bounds = array<i64: 4>}, {transform_indices = @transform_2, window_bounds = array<i64: 4, 3>}, {transform_indices = @transform_3, window_bounds = array<i64: 3>}, {transform_indices = @transform_4, window_bounds = array<i64: 4, 128>}, {transform_indices = @transform_5, window_bounds = array<i64: 3, 128>}]} {
    %c0 = arith.constant 0 : index
    %c0_0 = arith.constant 0 : index
    %0 = vector.load %arg5[%c0, %c0_0] : memref<4x128xf32, #tpu.memory_space<vmem>>, vector<4x128xf32>
    %1 = vector.extract_strided_slice %0 {offsets = [0, 0], sizes = [1, 128], strides = [1, 1]} : vector<4x128xf32> to vector<1x128xf32>
    %c0_1 = arith.constant 0 : index
    %c0_2 = arith.constant 0 : index
    %2 = memref.load %arg1[%c0_1, %c0_2] : memref<4x4xf32, #tpu.memory_space<smem>>
    %3 = vector.broadcast %2 : f32 to vector<1x128xf32>
    %4 = arith.mulf %1, %3 : vector<1x128xf32>
    %5 = vector.extract_strided_slice %0 {offsets = [1, 0], sizes = [1, 128], strides = [1, 1]} : vector<4x128xf32> to vector<1x128xf32>
    %c1 = arith.constant 1 : index
    %c0_3 = arith.constant 0 : index
    %6 = memref.load %arg1[%c1, %c0_3] : memref<4x4xf32, #tpu.memory_space<smem>>
    %7 = vector.broadcast %6 : f32 to vector<1x128xf32>
    %8 = arith.mulf %5, %7 : vector<1x128xf32>
    %9 = arith.addf %4, %8 : vector<1x128xf32>
    %10 = vector.extract_strided_slice %0 {offsets = [2, 0], sizes = [1, 128], strides = [1, 1]} : vector<4x128xf32> to vector<1x128xf32>
    %c2 = arith.constant 2 : index
    %c0_4 = arith.constant 0 : index
    %11 = memref.load %arg1[%c2, %c0_4] : memref<4x4xf32, #tpu.memory_space<smem>>
    %12 = vector.broadcast %11 : f32 to vector<1x128xf32>
    %13 = arith.mulf %10, %12 : vector<1x128xf32>
    %14 = arith.addf %9, %13 : vector<1x128xf32>
    %15 = vector.extract_strided_slice %0 {offsets = [3, 0], sizes = [1, 128], strides = [1, 1]} : vector<4x128xf32> to vector<1x128xf32>
    %c3 = arith.constant 3 : index
    %c0_5 = arith.constant 0 : index
    %16 = memref.load %arg1[%c3, %c0_5] : memref<4x4xf32, #tpu.memory_space<smem>>
    %17 = vector.broadcast %16 : f32 to vector<1x128xf32>
    %18 = arith.mulf %15, %17 : vector<1x128xf32>
    %19 = arith.addf %14, %18 : vector<1x128xf32>
    %c0_6 = arith.constant 0 : index
    %20 = memref.load %arg2[%c0_6] : memref<4xf32, #tpu.memory_space<smem>>
    %21 = vector.broadcast %20 : f32 to vector<1x128xf32>
    %22 = arith.addf %19, %21 : vector<1x128xf32>
    %cst = arith.constant 0.000000e+00 : f32
    %23 = vector.broadcast %cst : f32 to vector<1x128xf32>
    %24 = arith.maximumf %22, %23 : vector<1x128xf32>
    %25 = vector.extract_strided_slice %0 {offsets = [0, 0], sizes = [1, 128], strides = [1, 1]} : vector<4x128xf32> to vector<1x128xf32>
    %c0_7 = arith.constant 0 : index
    %c1_8 = arith.constant 1 : index
    %26 = memref.load %arg1[%c0_7, %c1_8] : memref<4x4xf32, #tpu.memory_space<smem>>
    %27 = vector.broadcast %26 : f32 to vector<1x128xf32>
    %28 = arith.mulf %25, %27 : vector<1x128xf32>
    %29 = vector.extract_strided_slice %0 {offsets = [1, 0], sizes = [1, 128], strides = [1, 1]} : vector<4x128xf32> to vector<1x128xf32>
    %c1_9 = arith.constant 1 : index
    %c1_10 = arith.constant 1 : index
    %30 = memref.load %arg1[%c1_9, %c1_10] : memref<4x4xf32, #tpu.memory_space<smem>>
    %31 = vector.broadcast %30 : f32 to vector<1x128xf32>
    %32 = arith.mulf %29, %31 : vector<1x128xf32>
    %33 = arith.addf %28, %32 : vector<1x128xf32>
    %34 = vector.extract_strided_slice %0 {offsets = [2, 0], sizes = [1, 128], strides = [1, 1]} : vector<4x128xf32> to vector<1x128xf32>
    %c2_11 = arith.constant 2 : index
    %c1_12 = arith.constant 1 : index
    %35 = memref.load %arg1[%c2_11, %c1_12] : memref<4x4xf32, #tpu.memory_space<smem>>
    %36 = vector.broadcast %35 : f32 to vector<1x128xf32>
    %37 = arith.mulf %34, %36 : vector<1x128xf32>
    %38 = arith.addf %33, %37 : vector<1x128xf32>
    %39 = vector.extract_strided_slice %0 {offsets = [3, 0], sizes = [1, 128], strides = [1, 1]} : vector<4x128xf32> to vector<1x128xf32>
    %c3_13 = arith.constant 3 : index
    %c1_14 = arith.constant 1 : index
    %40 = memref.load %arg1[%c3_13, %c1_14] : memref<4x4xf32, #tpu.memory_space<smem>>
    %41 = vector.broadcast %40 : f32 to vector<1x128xf32>
    %42 = arith.mulf %39, %41 : vector<1x128xf32>
    %43 = arith.addf %38, %42 : vector<1x128xf32>
    %c1_15 = arith.constant 1 : index
    %44 = memref.load %arg2[%c1_15] : memref<4xf32, #tpu.memory_space<smem>>
    %45 = vector.broadcast %44 : f32 to vector<1x128xf32>
    %46 = arith.addf %43, %45 : vector<1x128xf32>
    %cst_16 = arith.constant 0.000000e+00 : f32
    %47 = vector.broadcast %cst_16 : f32 to vector<1x128xf32>
    %48 = arith.maximumf %46, %47 : vector<1x128xf32>
    %49 = vector.extract_strided_slice %0 {offsets = [0, 0], sizes = [1, 128], strides = [1, 1]} : vector<4x128xf32> to vector<1x128xf32>
    %c0_17 = arith.constant 0 : index
    %c2_18 = arith.constant 2 : index
    %50 = memref.load %arg1[%c0_17, %c2_18] : memref<4x4xf32, #tpu.memory_space<smem>>
    %51 = vector.broadcast %50 : f32 to vector<1x128xf32>
    %52 = arith.mulf %49, %51 : vector<1x128xf32>
    %53 = vector.extract_strided_slice %0 {offsets = [1, 0], sizes = [1, 128], strides = [1, 1]} : vector<4x128xf32> to vector<1x128xf32>
    %c1_19 = arith.constant 1 : index
    %c2_20 = arith.constant 2 : index
    %54 = memref.load %arg1[%c1_19, %c2_20] : memref<4x4xf32, #tpu.memory_space<smem>>
    %55 = vector.broadcast %54 : f32 to vector<1x128xf32>
    %56 = arith.mulf %53, %55 : vector<1x128xf32>
    %57 = arith.addf %52, %56 : vector<1x128xf32>
    %58 = vector.extract_strided_slice %0 {offsets = [2, 0], sizes = [1, 128], strides = [1, 1]} : vector<4x128xf32> to vector<1x128xf32>
    %c2_21 = arith.constant 2 : index
    %c2_22 = arith.constant 2 : index
    %59 = memref.load %arg1[%c2_21, %c2_22] : memref<4x4xf32, #tpu.memory_space<smem>>
    %60 = vector.broadcast %59 : f32 to vector<1x128xf32>
    %61 = arith.mulf %58, %60 : vector<1x128xf32>
    %62 = arith.addf %57, %61 : vector<1x128xf32>
    %63 = vector.extract_strided_slice %0 {offsets = [3, 0], sizes = [1, 128], strides = [1, 1]} : vector<4x128xf32> to vector<1x128xf32>
    %c3_23 = arith.constant 3 : index
    %c2_24 = arith.constant 2 : index
    %64 = memref.load %arg1[%c3_23, %c2_24] : memref<4x4xf32, #tpu.memory_space<smem>>
    %65 = vector.broadcast %64 : f32 to vector<1x128xf32>
    %66 = arith.mulf %63, %65 : vector<1x128xf32>
    %67 = arith.addf %62, %66 : vector<1x128xf32>
    %c2_25 = arith.constant 2 : index
    %68 = memref.load %arg2[%c2_25] : memref<4xf32, #tpu.memory_space<smem>>
    %69 = vector.broadcast %68 : f32 to vector<1x128xf32>
    %70 = arith.addf %67, %69 : vector<1x128xf32>
    %cst_26 = arith.constant 0.000000e+00 : f32
    %71 = vector.broadcast %cst_26 : f32 to vector<1x128xf32>
    %72 = arith.maximumf %70, %71 : vector<1x128xf32>
    %73 = vector.extract_strided_slice %0 {offsets = [0, 0], sizes = [1, 128], strides = [1, 1]} : vector<4x128xf32> to vector<1x128xf32>
    %c0_27 = arith.constant 0 : index
    %c3_28 = arith.constant 3 : index
    %74 = memref.load %arg1[%c0_27, %c3_28] : memref<4x4xf32, #tpu.memory_space<smem>>
    %75 = vector.broadcast %74 : f32 to vector<1x128xf32>
    %76 = arith.mulf %73, %75 : vector<1x128xf32>
    %77 = vector.extract_strided_slice %0 {offsets = [1, 0], sizes = [1, 128], strides = [1, 1]} : vector<4x128xf32> to vector<1x128xf32>
    %c1_29 = arith.constant 1 : index
    %c3_30 = arith.constant 3 : index
    %78 = memref.load %arg1[%c1_29, %c3_30] : memref<4x4xf32, #tpu.memory_space<smem>>
    %79 = vector.broadcast %78 : f32 to vector<1x128xf32>
    %80 = arith.mulf %77, %79 : vector<1x128xf32>
    %81 = arith.addf %76, %80 : vector<1x128xf32>
    %82 = vector.extract_strided_slice %0 {offsets = [2, 0], sizes = [1, 128], strides = [1, 1]} : vector<4x128xf32> to vector<1x128xf32>
    %c2_31 = arith.constant 2 : index
    %c3_32 = arith.constant 3 : index
    %83 = memref.load %arg1[%c2_31, %c3_32] : memref<4x4xf32, #tpu.memory_space<smem>>
    %84 = vector.broadcast %83 : f32 to vector<1x128xf32>
    %85 = arith.mulf %82, %84 : vector<1x128xf32>
    %86 = arith.addf %81, %85 : vector<1x128xf32>
    %87 = vector.extract_strided_slice %0 {offsets = [3, 0], sizes = [1, 128], strides = [1, 1]} : vector<4x128xf32> to vector<1x128xf32>
    %c3_33 = arith.constant 3 : index
    %c3_34 = arith.constant 3 : index
    %88 = memref.load %arg1[%c3_33, %c3_34] : memref<4x4xf32, #tpu.memory_space<smem>>
    %89 = vector.broadcast %88 : f32 to vector<1x128xf32>
    %90 = arith.mulf %87, %89 : vector<1x128xf32>
    %91 = arith.addf %86, %90 : vector<1x128xf32>
    %c3_35 = arith.constant 3 : index
    %92 = memref.load %arg2[%c3_35] : memref<4xf32, #tpu.memory_space<smem>>
    %93 = vector.broadcast %92 : f32 to vector<1x128xf32>
    %94 = arith.addf %91, %93 : vector<1x128xf32>
    %cst_36 = arith.constant 0.000000e+00 : f32
    %95 = vector.broadcast %cst_36 : f32 to vector<1x128xf32>
    %96 = arith.maximumf %94, %95 : vector<1x128xf32>
    %c0_37 = arith.constant 0 : index
    %c0_38 = arith.constant 0 : index
    %97 = memref.load %arg3[%c0_37, %c0_38] : memref<4x3xf32, #tpu.memory_space<smem>>
    %98 = vector.broadcast %97 : f32 to vector<1x128xf32>
    %99 = arith.mulf %24, %98 : vector<1x128xf32>
    %c1_39 = arith.constant 1 : index
    %c0_40 = arith.constant 0 : index
    %100 = memref.load %arg3[%c1_39, %c0_40] : memref<4x3xf32, #tpu.memory_space<smem>>
    %101 = vector.broadcast %100 : f32 to vector<1x128xf32>
    %102 = arith.mulf %48, %101 : vector<1x128xf32>
    %103 = arith.addf %99, %102 : vector<1x128xf32>
    %c2_41 = arith.constant 2 : index
    %c0_42 = arith.constant 0 : index
    %104 = memref.load %arg3[%c2_41, %c0_42] : memref<4x3xf32, #tpu.memory_space<smem>>
    %105 = vector.broadcast %104 : f32 to vector<1x128xf32>
    %106 = arith.mulf %72, %105 : vector<1x128xf32>
    %107 = arith.addf %103, %106 : vector<1x128xf32>
    %c3_43 = arith.constant 3 : index
    %c0_44 = arith.constant 0 : index
    %108 = memref.load %arg3[%c3_43, %c0_44] : memref<4x3xf32, #tpu.memory_space<smem>>
    %109 = vector.broadcast %108 : f32 to vector<1x128xf32>
    %110 = arith.mulf %96, %109 : vector<1x128xf32>
    %111 = arith.addf %107, %110 : vector<1x128xf32>
    %c0_45 = arith.constant 0 : index
    %112 = memref.load %arg4[%c0_45] : memref<3xf32, #tpu.memory_space<smem>>
    %113 = vector.broadcast %112 : f32 to vector<1x128xf32>
    %114 = arith.addf %111, %113 : vector<1x128xf32>
    %c0_46 = arith.constant 0 : index
    %c1_47 = arith.constant 1 : index
    %115 = memref.load %arg3[%c0_46, %c1_47] : memref<4x3xf32, #tpu.memory_space<smem>>
    %116 = vector.broadcast %115 : f32 to vector<1x128xf32>
    %117 = arith.mulf %24, %116 : vector<1x128xf32>
    %c1_48 = arith.constant 1 : index
    %c1_49 = arith.constant 1 : index
    %118 = memref.load %arg3[%c1_48, %c1_49] : memref<4x3xf32, #tpu.memory_space<smem>>
    %119 = vector.broadcast %118 : f32 to vector<1x128xf32>
    %120 = arith.mulf %48, %119 : vector<1x128xf32>
    %121 = arith.addf %117, %120 : vector<1x128xf32>
    %c2_50 = arith.constant 2 : index
    %c1_51 = arith.constant 1 : index
    %122 = memref.load %arg3[%c2_50, %c1_51] : memref<4x3xf32, #tpu.memory_space<smem>>
    %123 = vector.broadcast %122 : f32 to vector<1x128xf32>
    %124 = arith.mulf %72, %123 : vector<1x128xf32>
    %125 = arith.addf %121, %124 : vector<1x128xf32>
    %c3_52 = arith.constant 3 : index
    %c1_53 = arith.constant 1 : index
    %126 = memref.load %arg3[%c3_52, %c1_53] : memref<4x3xf32, #tpu.memory_space<smem>>
    %127 = vector.broadcast %126 : f32 to vector<1x128xf32>
    %128 = arith.mulf %96, %127 : vector<1x128xf32>
    %129 = arith.addf %125, %128 : vector<1x128xf32>
    %c1_54 = arith.constant 1 : index
    %130 = memref.load %arg4[%c1_54] : memref<3xf32, #tpu.memory_space<smem>>
    %131 = vector.broadcast %130 : f32 to vector<1x128xf32>
    %132 = arith.addf %129, %131 : vector<1x128xf32>
    %c0_55 = arith.constant 0 : index
    %c2_56 = arith.constant 2 : index
    %133 = memref.load %arg3[%c0_55, %c2_56] : memref<4x3xf32, #tpu.memory_space<smem>>
    %134 = vector.broadcast %133 : f32 to vector<1x128xf32>
    %135 = arith.mulf %24, %134 : vector<1x128xf32>
    %c1_57 = arith.constant 1 : index
    %c2_58 = arith.constant 2 : index
    %136 = memref.load %arg3[%c1_57, %c2_58] : memref<4x3xf32, #tpu.memory_space<smem>>
    %137 = vector.broadcast %136 : f32 to vector<1x128xf32>
    %138 = arith.mulf %48, %137 : vector<1x128xf32>
    %139 = arith.addf %135, %138 : vector<1x128xf32>
    %c2_59 = arith.constant 2 : index
    %c2_60 = arith.constant 2 : index
    %140 = memref.load %arg3[%c2_59, %c2_60] : memref<4x3xf32, #tpu.memory_space<smem>>
    %141 = vector.broadcast %140 : f32 to vector<1x128xf32>
    %142 = arith.mulf %72, %141 : vector<1x128xf32>
    %143 = arith.addf %139, %142 : vector<1x128xf32>
    %c3_61 = arith.constant 3 : index
    %c2_62 = arith.constant 2 : index
    %144 = memref.load %arg3[%c3_61, %c2_62] : memref<4x3xf32, #tpu.memory_space<smem>>
    %145 = vector.broadcast %144 : f32 to vector<1x128xf32>
    %146 = arith.mulf %96, %145 : vector<1x128xf32>
    %147 = arith.addf %143, %146 : vector<1x128xf32>
    %c2_63 = arith.constant 2 : index
    %148 = memref.load %arg4[%c2_63] : memref<3xf32, #tpu.memory_space<smem>>
    %149 = vector.broadcast %148 : f32 to vector<1x128xf32>
    %150 = arith.addf %147, %149 : vector<1x128xf32>
    %151 = tpu.concatenate %114, %132, %150 in 0 : vector<1x128xf32>, vector<1x128xf32>, vector<1x128xf32> -> vector<3x128xf32>
    %c0_64 = arith.constant 0 : index
    %c0_65 = arith.constant 0 : index
    %152 = vector.load %arg6[%c0_64, %c0_65] : memref<3x128xf32, #tpu.memory_space<vmem>>, vector<3x128xf32>
    tpu.vector_store %arg6[%c0_64, %c0_65], %151 {strides = array<i32>} : memref<3x128xf32, #tpu.memory_space<vmem>>, vector<3x128xf32>,
    return
  }
  func.func @transform_0(%arg0: i32) -> (i32, i32) {
    %c0_i32 = arith.constant 0 : i32
    %c0_i32_0 = arith.constant 0 : i32
    %c0_i32_1 = arith.constant 0 : i32
    return %c0_i32, %c0_i32_0 : i32, i32
  }
  func.func @transform_1(%arg0: i32) -> i32 {
    %c0_i32 = arith.constant 0 : i32
    %c0_i32_0 = arith.constant 0 : i32
    return %c0_i32 : i32
  }
  func.func @transform_2(%arg0: i32) -> (i32, i32) {
    %c0_i32 = arith.constant 0 : i32
    %c0_i32_0 = arith.constant 0 : i32
    %c0_i32_1 = arith.constant 0 : i32
    return %c0_i32, %c0_i32_0 : i32, i32
  }
  func.func @transform_3(%arg0: i32) -> i32 {
    %c0_i32 = arith.constant 0 : i32
    %c0_i32_0 = arith.constant 0 : i32
    return %c0_i32 : i32
  }
  func.func @transform_4(%arg0: i32) -> (i32, i32) {
    %c0_i32 = arith.constant 0 : i32
    %c0_i32_0 = arith.constant 0 : i32
    return %c0_i32, %arg0 : i32, i32
  }
  func.func @transform_5(%arg0: i32) -> (i32, i32) {
    %c0_i32 = arith.constant 0 : i32
    %c0_i32_0 = arith.constant 0 : i32
    return %c0_i32, %arg0 : i32, i32
  }
}

</mosaic_0001>

<bundles_post_ra>
// kernel: tpu_custom_call.1
= control target key start
LH: loop header
LB: loop body
LE: loop exit
PB: predicated region body
PF: predicated region fallthrough
CT: control target
= control target key end

     0   :  { %10 = vsyncpa [#allocation4], 0  ;;  %s547_s0 = inlined_call_operand.hbm [shape: f32[4,4], index: 0, kind: input, shape index: {}]   ;;  %s548_s1 = inlined_call_operand.vmem [shape: f32[4], index: 1, kind: input, shape index: {}]   ;;  %s549_s2 = inlined_call_operand.vmem [shape: f32[4,3], index: 2, kind: input, shape index: {}]   ;;  %s550_s3 = inlined_call_operand.vmem [shape: f32[3], index: 3, kind: input, shape index: {}]   ;;  %s551_s4 = inlined_call_operand.vmem [shape: f32[4,128], index: 4, kind: input, shape index: {}]   ;;  %s552_s5 = inlined_call_operand.hbm [shape: f32[3,128], index: 5, kind: output, shape index: {}]  }
   0x1   :  { %11 = vsyncpa [#allocation5], 0 }
   0x2   :  { %12 = vsyncpa [#allocation8], 0  ;;  %s38_s20 = sshll.u32 %s549_s2, 4  ;;  %s39_s20 = int_to_ptr.vmem [resolvable:$true] %s38_s20 }
   0x3   :  { %13 = vsyncpa [#allocation3], 0  ;;  %s298_s21 = scalar_lea.vmem %s39_s20, 64  ;;  %p303_p1 = scmp.lt.s32.totalorder %s39_s20, %s39_s20 }
   0x4   :  { %p299_p0 = scmp.ne.s32.totalorder %s39_s20, %s298_s21  ;;  %p304_p2 = scmp.lt.s32.totalorder %s298_s21, %s298_s21 }
   0x6   :  { %p305_p3 = por %p304_p2, %p303_p1 }
   0x8   :  { %p306_p4 = pnand %p305_p3, %p299_p0 }
   0xa   :  { %309 = shalt.err (!%p306_p4)
}
   0xb   :  { %s374_s22 = smov [#allocation7]   ;;  %s310_s25 = scalar_lea.hbm %s547_s0, 64 }
   0xc   :  { %41 = dma.vmem_to_smem %s39_s20, 64, %s374_s22, [#allocation8]  }
   0xd   :  { %p311_p5 = scmp.ne.s32.totalorder %s547_s0, %s310_s25  ;;  %p314_p6 = scmp.lt.u32.totalorder %s310_s25, %s547_s0 }
   0xf   :  { %p316_p7 = pnand %p314_p6, %p311_p5 }
  0x11   :  { %319 = shalt.err (!%p316_p7)
}
  0x12   :  { %s375_s29 = smov [#allocation2]   ;;  %s28_s9 = sshll.u32 %s548_s1, 4  ;;  %s29_s9 = int_to_ptr.vmem [resolvable:$true] %s28_s9 }
  0x13   :  { %21 = dma.hbm_to_smem %s547_s0, 64, %s375_s29, [#allocation4]  }
  0x14   :  { %s48_s12 = sshll.u32 %s550_s3, 4  ;;  %s320_s13 = scalar_lea.vmem %s29_s9, 16  ;;  %s49_s12 = int_to_ptr.vmem [resolvable:$true] %s48_s12 }
  0x15   :  { %p321_p8 = scmp.ne.s32.totalorder %s29_s9, %s320_s13  ;;  %p325_p9 = scmp.lt.s32.totalorder %s29_s9, %s29_s9 }
  0x16   :  { %p326_p10 = scmp.lt.s32.totalorder %s320_s13, %s320_s13 }
  0x18   :  { %p327_p11 = por %p326_p10, %p325_p9 }
  0x1a   :  { %p328_p12 = pnand %p327_p11, %p321_p8 }
  0x1c   :  { %331 = shalt.err (!%p328_p12)
}
  0x1d   :  { %s376_s14 = smov [#allocation6]   ;;  %s332_s0 = scalar_lea.vmem %s49_s12, 16 }
  0x1e   :  { %31 = dma.vmem_to_smem %s29_s9, 16, %s376_s14, [#allocation5]  }
  0x1f   :  { %p333_p13 = scmp.ne.s32.totalorder %s49_s12, %s332_s0  ;;  %p337_p0 = scmp.lt.s32.totalorder %s49_s12, %s49_s12 }
  0x20   :  { %p338_p1 = scmp.lt.s32.totalorder %s332_s0, %s332_s0 }
  0x22   :  { %p339_p2 = por %p338_p1, %p337_p0 }
  0x24   :  { %p340_p3 = pnand %p339_p2, %p333_p13 }
  0x26   :  { %343 = shalt.err (!%p340_p3)
}
  0x27   :  { %s377_s1 = smov [#allocation9]  }
  0x28   :  { %51 = dma.vmem_to_smem %s49_s12, 16, %s377_s1, [#allocation8]  }
  0x29   :  { %366 = dma.done.wait [#allocation4], 64  }
  0x2a   :  { %367 = vsyncadd [#allocation4], 4294967232 }
  0x2b   :  { %368 = dma.done.wait [#allocation5], 16  }
  0x2c   :  { %369 = vsyncadd [#allocation5], 4294967280 }
  0x2d   :  { %370 = dma.done.wait [#allocation8], 80  }
  0x2e   :  { %371 = vsyncadd [#allocation8], 4294967216 }
  0x2f   :  { %66 = sfence }
  0x30   :  { %s68_s3 = sld [smem:[#allocation2]]  ;;  %s265_s19 = sld [smem:[#allocation2 + $0x1]]  ;;  %v435_v0 = vld [vmem:[%s551_s4] sm:$0xf]  ;;  %vm240_vm0 = vcmask 1040384   ;;  %vm242_vm1 = vcmask 1041408  }
  0x31   :  { %s262_s15 = sld [smem:[#allocation2 + $0x80]]  ;;  %s266_s20 = sld [smem:[#allocation2 + $0x81]] }
  0x32   :  { %s263_s16 = sld [smem:[#allocation2 + $0x100]]  ;;  %s267_s21 = sld [smem:[#allocation2 + $0x101]] }
  0x33   :  { %s264_s17 = sld [smem:[#allocation2 + $0x180]]  ;;  %s437_s24 = sld [smem:[#allocation2 + $0x181]] }
  0x34   :  { %s430_s18 = sld [smem:[#allocation6]]  ;;  %s439_s25 = sld [smem:[#allocation2 + $0x2]] }
  0x35   :  { %s441_s26 = sld [smem:[#allocation2 + $0x82]]  ;;  %s449_s4 = sld [smem:[#allocation6 + $0x1]] }
  0x36   :  { %v69_v1 = vstv %s68_s3  ;;  %s443_s27 = sld [smem:[#allocation2 + $0x102]]  ;;  %s451_s28 = sld [smem:[#allocation2 + $0x3]]  ;;  %v97_v9 = vstv %s265_s19 }
  0x37   :  { %v72_v2 = vstv %s262_s15  ;;  %s445_s2 = sld [smem:[#allocation2 + $0x182]]  ;;  %v70_v3 = vmul.f32 %v69_v1, %v435_v0  ;;  %v100_v12 = vstv %s266_s20  ;;  %s456_s29 = sld [smem:[#allocation2 + $0x83]]  ;;  %v98_v15 = vmul.f32 %v97_v9, %v435_v0 }
  0x38   :  { %v73_v4 = vmul.f32 %v72_v2, %v435_v0  ;;  %v79_v5 = vstv %s263_s16  ;;  %v107_v13 = vstv %s267_s21  ;;  %s458_s30 = sld [smem:[#allocation2 + $0x103]]  ;;  %v101_v16 = vmul.f32 %v100_v12, %v435_v0  ;;  %s467_s7 = sld [smem:[#allocation7]] }
  0x39   :  { %v86_v6 = vstv %s264_s17  ;;  %v80_v7 = vmul.f32 %v79_v5, %v435_v0  ;;  %v108_v17 = vmul.f32 %v107_v13, %v435_v0  ;;  %v114_v20 = vstv %s437_s24  ;;  %s465_s6 = sld [smem:[#allocation2 + $0x183]]  ;;  %s474_s8 = sld [smem:[#allocation6 + $0x2]] }
  0x3a   :  { %v87_v8 = vmul.f32 %v86_v6, %v435_v0  ;;  %v75_v10 = vrot.slane %v73_v4, 1  ;;  %v93_v11 = vstv %s430_s18  ;;  %v125_v21 = vstv %s439_s25  ;;  %s476_s9 = sld [smem:[#allocation7 + $0x80]]  ;;  %s483_s10 = sld [smem:[#allocation7 + $0x1]] }
  0x3b   :  { %v82_v14 = vrot.slane %v80_v7, 2  ;;  %v103_v22 = vrot.slane %v101_v16, 1  ;;  %v110_v23 = vrot.slane %v108_v17, 2  ;;  %v115_v24 = vmul.f32 %v114_v20, %v435_v0  ;;  %s485_s11 = sld [smem:[#allocation7 + $0x81]]  ;;  %s488_s12 = sld [smem:[#allocation6 + $0x3]] }
  0x3c   :  { %v77_v18 = vadd.f32 %v75_v10, %v70_v3  ;;  %v89_v19 = vrot.slane %v87_v8, 3  ;;  %v126_v25 = vmul.f32 %v125_v21, %v435_v0  ;;  %v128_v27 = vstv %s441_s26  ;;  %s492_s13 = sld [smem:[#allocation7 + $0x100]]  ;;  %s494_s14 = sld [smem:[#allocation7 + $0x101]] }
  0x3d   :  { %v135_v28 = vstv %s443_s27  ;;  %v142_v29 = vstv %s445_s2  ;;  %v105_v30 = vadd.f32 %v103_v22, %v98_v15  ;;  %v117_v31 = vrot.slane %v115_v24, 3  ;;  %s498_s0 = sld [smem:[#allocation7 + $0x2]]  ;;  %s506_s15 = sld [smem:[#allocation7 + $0x180]] }
  0x3e   :  { %v84_v26 = vadd.f32 %v82_v14, %v77_v18  ;;  %v129_v32 = vmul.f32 %v128_v27, %v435_v0  ;;  %v136_v33 = vmul.f32 %v135_v28, %v435_v0  ;;  %v121_v35 = vstv %s449_s4  ;;  %s502_s1 = sld [smem:[#allocation7 + $0x82]]  ;;  %s511_s16 = sld [smem:[#allocation7 + $0x181]] }
  0x3f   :  { %v143_v36 = vmul.f32 %v142_v29, %v435_v0  ;;  %v153_v37 = vstv %s451_s28  ;;  %v112_v38 = vadd.f32 %v110_v23, %v105_v30  ;;  %v156_v44 = vstv %s456_s29  ;;  %s504_s3 = sld [smem:[#allocation7 + $0x102]]  ;;  %s517_s18 = sld [smem:[#allocation9]] }
  0x40   :  { %v91_v34 = vadd.f32 %v89_v19, %v84_v26  ;;  %v131_v39 = vrot.slane %v129_v32, 1  ;;  %v138_v40 = vrot.slane %v136_v33, 2  ;;  %v154_v41 = vmul.f32 %v153_v37, %v435_v0  ;;  %s513_s17 = sld [smem:[#allocation7 + $0x182]]  ;;  %s522_s19 = sld [smem:[#allocation9 + $0x1]] }
  0x41   :  { %v145_v43 = vrot.slane %v143_v36, 3  ;;  %v163_v45 = vstv %s458_s30  ;;  %v119_v46 = vadd.f32 %v117_v31, %v112_v38  ;;  %v157_v48 = vmul.f32 %v156_v44, %v435_v0  ;;  %s524_s20 = sld [smem:[#allocation9 + $0x2]]  ;;  %s378_s21 = smov [#allocation10]  }
  0x42   :  { %v94_v42 = vadd.f32 %v93_v11, %v91_v34  ;;  %v133_v47 = vadd.f32 %v131_v39, %v126_v25  ;;  %v164_v49 = vmul.f32 %v163_v45, %v435_v0  ;;  %v170_v51 = vstv %s465_s6  ;;  %s251_s22 = sshll.u32 %s378_s21, 4  ;;  %s252_s22 = int_to_ptr.vmem [resolvable:$true] %s251_s22 }
  0x43   :  { %v181_v52 = vstv %s467_s7  ;;  %v122_v53 = vadd.f32 %v121_v35, %v119_v46  ;;  %v159_v55 = vrot.slane %v157_v48, 1  ;;  %v149_v57 = vstv %s474_s8  ;;  %s344_s23 = scalar_lea.vmem %s252_s22, 64  ;;  %p349_p5 = scmp.lt.s32.totalorder %s252_s22, %s252_s22 }
  0x44   :  { %v95_v50 = vmax.f32 %v94_v42, 0.0  ;;  %v140_v54 = vadd.f32 %v138_v40, %v133_v47  ;;  %v166_v56 = vrot.slane %v164_v49, 2  ;;  %v171_v58 = vmul.f32 %v170_v51, %v435_v0  ;;  %p345_p4 = scmp.ne.s32.totalorder %s252_s22, %s344_s23  ;;  %p350_p6 = scmp.lt.s32.totalorder %s344_s23, %s344_s23 }
  0x45   :  { %v184_v59 = vstv %s476_s9  ;;  %v123_v60 = vmax.f32 %v122_v53, 0.0  ;;  %v161_v62 = vadd.f32 %v159_v55, %v154_v41  ;;  %v199_v2 = vstv %s483_s10 }
  0x46   :  { %v147_v61 = vadd.f32 %v145_v43, %v140_v54  ;;  %v182_v63 = vmul.f32 %v181_v52, %v95_v50  ;;  %v173_v1 = vrot.slane %v171_v58, 3  ;;  %v202_v3 = vstv %s485_s11  ;;  %p351_p7 = por %p350_p6, %p349_p5 }
  0x47   :  { %v168_v5 = vadd.f32 %v166_v56, %v161_v62  ;;  %v185_v0 = vmul.f32 %v184_v59, %v123_v60  ;;  %v200_v6 = vmul.f32 %v199_v2, %v95_v50  ;;  %v177_v7 = vstv %s488_s12 }
  0x48   :  { %v150_v4 = vadd.f32 %v149_v57, %v147_v61  ;;  %v188_v8 = vstv %s492_s13  ;;  %v203_v9 = vmul.f32 %v202_v3, %v123_v60  ;;  %v206_v10 = vstv %s494_s14  ;;  %p352_p8 = pnand %p351_p7, %p345_p4 }
  0x49   :  { %v175_v12 = vadd.f32 %v173_v1, %v168_v5  ;;  %v186_v13 = vadd.f32 %v185_v0, %v182_v63  ;;  %v217_v14 = vstv %s498_s0  ;;  %v220_v17 = vstv %s502_s1 }
  0x4a   :  { %v151_v11 = vmax.f32 %v150_v4, 0.0  ;;  %v204_v15 = vadd.f32 %v203_v9, %v200_v6  ;;  %v218_v16 = vmul.f32 %v217_v14, %v95_v50  ;;  %v224_v18 = vstv %s504_s3 }
  0x4b   :  { %v178_v19 = vadd.f32 %v177_v7, %v175_v12  ;;  %v221_v22 = vmul.f32 %v220_v17, %v123_v60  ;;  %v192_v23 = vstv %s506_s15  ;;  %v210_v24 = vstv %s511_s16 }
  0x4c   :  { %v189_v20 = vmul.f32 %v188_v8, %v151_v11  ;;  %v207_v21 = vmul.f32 %v206_v10, %v151_v11  ;;  %v225_v25 = vmul.f32 %v224_v18, %v151_v11  ;;  %v228_v26 = vstv %s513_s17 }
  0x4d   :  { %v179_v27 = vmax.f32 %v178_v19, 0.0  ;;  %v222_v30 = vadd.f32 %v221_v22, %v218_v16  ;;  %v196_v35 = vstv %s517_s18  ;;  %v214_v36 = vstv %s522_s19 }
  0x4e   :  { %v190_v28 = vadd.f32 %v189_v20, %v186_v13  ;;  %v208_v29 = vadd.f32 %v207_v21, %v204_v15  ;;  %v232_v37 = vstv %s524_s20 }
  0x4f   :  { %v193_v31 = vmul.f32 %v192_v23, %v179_v27  ;;  %v211_v32 = vmul.f32 %v210_v24, %v179_v27  ;;  %v226_v33 = vadd.f32 %v225_v25, %v222_v30  ;;  %v229_v34 = vmul.f32 %v228_v26, %v179_v27 }
  0x51   :  { %v194_v38 = vadd.f32 %v193_v31, %v190_v28  ;;  %v212_v39 = vadd.f32 %v211_v32, %v208_v29  ;;  %v230_v40 = vadd.f32 %v229_v34, %v226_v33 }
  0x53   :  { %v197_v41 = vadd.f32 %v196_v35, %v194_v38  ;;  %v215_v42 = vadd.f32 %v214_v36, %v212_v39  ;;  %v233_v43 = vadd.f32 %v232_v37, %v230_v40 }
  0x55   :  { %v235_v44 = vrot.slane %v215_v42, 7  ;;  %v238_v45 = vrot.slane %v233_v43, 6 }
  0x57   :  { %v241_v46 = vsel %vm240_vm0, %v197_v41, %v235_v44 }
  0x58   :  { %v243_v47 = vsel %vm242_vm1, %v241_v46, %v238_v45 }
  0x59   :  { %244 = vst [vmem:[#allocation10] sm:$0x7] %v243_v47 }
  0x5a   :  { %355 = shalt.err (!%p352_p8)
}
  0x5b   :  { %s356_s26 = scalar_lea.hbm %s552_s5, 64 }
  0x5c   :  { %p357_p9 = scmp.ne.s32.totalorder %s552_s5, %s356_s26  ;;  %p360_p10 = scmp.lt.u32.totalorder %s356_s26, %s552_s5 }
  0x5e   :  { %p362_p11 = pnand %p360_p10, %p357_p9 }
  0x60   :  { %365 = shalt.err (!%p362_p11)
}
  0x61   :  { %254 = dma.vmem_to_hbm [thread:$0]  %s252_s22, 64, %s552_s5, [#allocation3]  }
  0x62   :  { %372 = dma.done.wait [#allocation3], 64  }
  0x63   :  { %373 = vsyncadd [#allocation3], 4294967232 }
  0x64   :  { %258 = vsyncpa [#allocation3], 1 }
  0x65   :  { %259 = vsyncpa [#allocation4], 1 }
  0x66   :  { %260 = vsyncpa [#allocation5], 1 }
  0x67   :  { %261 = vsyncpa [#allocation8], 1 }

</bundles_post_ra>
